<compile_context>
chip_gen: v7x
topology: tpu7x:2x2x1
jax: 0.10.0
libtpu: 0.0.40
codegen_flags: <defaults>
</compile_context>

<pallas_src>
import functools

import jax
import jax.numpy as jnp
from jax.experimental import pallas as pl
from jax.experimental.pallas import tpu as pltpu


def _round_up(x, m):
    return (x + m - 1) // m * m


# ---------------------------------------------------------------------------
# Fused conv + BatchNorm(training) + ReLU kernel
# ---------------------------------------------------------------------------

def _fused_conv_bn_relu_kernel(x_ref, w_ref, gamma_ref, beta_ref, o_ref,
                               sum_ref, sumsq_ref, *,
                               K, stride, dilation, TL, L_out, inv_count, eps,
                               needs_mask):
    p = pl.program_id(0)     # 0 = stats pass, 1 = normalize/write pass
    n = pl.program_id(1)     # batch sample
    lt = pl.program_id(2)    # tile index along output length

    # Zero the per-channel accumulators at the very first grid step.
    @pl.when((p == 0) & (n == 0) & (lt == 0))
    def _():
        sum_ref[...] = jnp.zeros_like(sum_ref)
        sumsq_ref[...] = jnp.zeros_like(sumsq_ref)

    # ----- convolution tile: acc = W_flat @ stacked, one MXU contraction ------
    l0 = pl.multiple_of(lt * (TL * stride), 128)   # TL is a multiple of 128
    if stride == 1:
        # One dynamic slab load (bf16); static shifted slices per tap.
        slab = x_ref[0, :, pl.ds(l0, TL + (K - 1) * dilation)]
        parts = [slab[:, k * dilation:k * dilation + TL] for k in range(K)]
    else:
        # TODO(synk): replace the K strided lane-gathers with one contiguous slab
        # + a single deinterleave (only the final ConvBlock layer can hit this).
        parts = [x_ref[0, :, pl.ds(l0 + k * dilation, TL, stride)]
                 for k in range(K)]
    stacked = parts[0] if K == 1 else jnp.concatenate(parts, axis=0)  # (K*C_in, TL)
    acc = jnp.dot(w_ref[...], stacked, preferred_element_type=jnp.float32)

    # NOTE: conv bias intentionally omitted -- it cancels exactly under
    # training-mode BatchNorm (mean shifts by the same per-channel constant).

    @pl.when(p == 0)
    def _():
        def _accumulate(a):
            sum_ref[...] += jnp.sum(a, axis=1, keepdims=True)
            sumsq_ref[...] += jnp.sum(a * a, axis=1, keepdims=True)

        if needs_mask:
            last = pl.num_programs(2) - 1

            @pl.when(lt != last)                     # no padded lanes here
            def _():
                _accumulate(acc)

            @pl.when(lt == last)                     # only final tile is masked
            def _():
                lane = jax.lax.broadcasted_iota(jnp.int32, acc.shape, 1) + lt * TL
                _accumulate(jnp.where(lane < L_out, acc, 0.0))
        else:
            _accumulate(acc)

    @pl.when(p == 1)
    def _():
        # TODO(synk): E[x^2]-E[x]^2 in f32 can cancel for very long sequences;
        # switch to a shifted / two-level accumulation if that regime matters.
        mean = sum_ref[...] * inv_count                       # (C_out, 1)
        var = sumsq_ref[...] * inv_count - mean * mean        # biased (training)
        inv_std = jax.lax.rsqrt(var + eps)                    # EUP slot
        scale = gamma_ref[...] * inv_std
        shift = beta_ref[...] - mean * scale
        o_ref[0] = jnp.maximum(acc * scale + shift, 0.0).astype(o_ref.dtype)


# ---------------------------------------------------------------------------
# Conv1d_layer forward (mode='conv', padding='SAME', norm='batch', act='relu')
# ---------------------------------------------------------------------------

def _reflect_pad_extend_bf16(x, l_pad, r_pad, extra):
    """ReflectionPad1d((l_pad, r_pad)) + zero-extend by `extra` + bf16 cast in a
    single materialization (one HBM round trip instead of two pads + a cast)."""
    xb = x.astype(jnp.bfloat16)
    parts = []
    if l_pad > 0:
        parts.append(xb[:, :, 1:l_pad + 1][:, :, ::-1])
    parts.append(xb)
    if r_pad > 0:
        parts.append(xb[:, :, -r_pad - 1:-1][:, :, ::-1])
    if extra > 0:
        parts.append(jnp.zeros(x.shape[:2] + (extra,), jnp.bfloat16))
    return parts[0] if len(parts) == 1 else jnp.concatenate(parts, axis=-1)


def conv1d_layer_forward(x, params, *, stride=1, dilation=1, eps=1e-5,
                         out_dtype=jnp.float32):
    """x: (N, C_in, L) -> (N, C_out, L_out) in out_dtype."""
    w, gamma, beta = params["w"], params["gamma"], params["beta"]
    N, C_in, L = x.shape
    C_out, _, K = w.shape

    # SAME reflection padding (nn.ReflectionPad1d((l_pad, r_pad)))
    pad = (K - 1) * dilation
    l_pad = pad // 2
    r_pad = pad - l_pad
    L_pad = L + pad
    L_out = (L_pad - dilation * (K - 1) - 1) // stride + 1

    # Length tiling: lane-dense tiles, sized so the f32 (C_out, TL) accumulator
    # (live across the whole body) stays well inside the 64x4KiB vreg file.
    if C_out <= 32:
        tl_max = 1024
    elif C_out <= 64:
        tl_max = 512
    else:
        tl_max = 256
    TL = min(tl_max, _round_up(L_out, 128))
    L_out_pad = _round_up(L_out, TL)
    T = L_out_pad // TL

    # Zero-extend so every in-kernel slice (incl. padded output columns) stays in
    # bounds; reflect pad + zero-extend + bf16 cast happen in ONE materialization.
    L_in_need = L_out_pad * stride + (K - 1) * dilation
    L_in_pad = _round_up(max(L_in_need, L_pad), 128)
    xp = _reflect_pad_extend_bf16(x, l_pad, r_pad, L_in_pad - L_pad)

    # Weights flattened so the MXU contracts over K*C_in in a single push:
    # w_flat[co, k*C_in + ci] = w[co, ci, k], matching the stacked operand layout.
    w_flat = jnp.transpose(w, (0, 2, 1)).reshape(C_out, K * C_in).astype(jnp.bfloat16)
    g2 = gamma.reshape(C_out, 1).astype(jnp.float32)
    b2 = beta.reshape(C_out, 1).astype(jnp.float32)

    kernel = functools.partial(
        _fused_conv_bn_relu_kernel,
        K=K, stride=stride, dilation=dilation, TL=TL, L_out=L_out,
        inv_count=1.0 / float(N * L_out), eps=float(eps),
        needs_mask=(L_out_pad != L_out))

    # Explicit scoped-VMEM budget: 2x double-buffered bf16 input sample + 2x
    # output tile + weights/scalars + headroom (defaults are 16/32 MiB and would
    # bite long sequences well before physical VMEM).
    in_blk = 2 * _round_up(C_in, 16) * L_in_pad * 2
    out_blk = 2 * _round_up(C_out, 8) * TL * jnp.dtype(out_dtype).itemsize
    w_blk = 2 * _round_up(C_out, 16) * _round_up(K * C_in, 128) * 2
    vmem_limit = min(128 << 20, max(in_blk + out_blk + w_blk + (4 << 20), 32 << 20))

    out = pl.pallas_call(
        kernel,
        out_shape=jax.ShapeDtypeStruct((N, C_out, L_out_pad), out_dtype),
        grid=(2, N, T),                      # (pass, batch, length tiles)
        in_specs=[
            # Whole (C_in, L) bf16 sample stays VMEM-resident across its L tiles
            # and both passes (block index only changes with n).
            # TODO(synk): for very long sequences on v7x (64 MiB VMEM), switch to
            # halo'd L tiles via manual make_async_copy double-buffering.
            pl.BlockSpec((1, C_in, L_in_pad), lambda p, n, l: (n, 0, 0)),
            pl.BlockSpec((C_out, K * C_in), lambda p, n, l: (0, 0)),
            pl.BlockSpec((C_out, 1), lambda p, n, l: (0, 0)),
            pl.BlockSpec((C_out, 1), lambda p, n, l: (0, 0)),
        ],
        # Pinned-output trick: during the stats pass (p == 0) the output block
        # index stays (0, 0, 0) and the kernel never writes o_ref, so no garbage
        # block is ever flushed; the first p == 1 step reuses index (0, 0, 0) and
        # writes it before the first writeback.  Each output block is therefore
        # written back exactly once, right after its p == 1 visit.
        out_specs=pl.BlockSpec((1, C_out, TL), lambda p, n, l: (n * p, 0, l * p)),
        scratch_shapes=[pltpu.VMEM((C_out, 1), jnp.float32),   # per-channel sum
                        pltpu.VMEM((C_out, 1), jnp.float32)],  # per-channel sumsq
        compiler_params=pltpu.CompilerParams(
            # Batch statistics couple every (n, l) tile -> sequential grid.
            # TODO(synk): on v7x, split the stats pass across the 2 TensorCores
            # (per-core partial sums + a tiny combine) to use both cores.
            dimension_semantics=("arbitrary", "arbitrary", "arbitrary"),
            vmem_limit_bytes=int(vmem_limit)),
    )(xp, w_flat, g2, b2)

    if L_out_pad != L_out:
        out = out[:, :, :L_out]
    return out


# ---------------------------------------------------------------------------
# ConvBlock (dimension=1)
# ---------------------------------------------------------------------------

def init_conv1d_layer_params(key, in_ch, out_ch, kernel_size):
    kw, kb = jax.random.split(key)
    fan_in = in_ch * kernel_size
    bound = 1.0 / jnp.sqrt(fan_in)
    w = jax.random.uniform(kw, (out_ch, in_ch, kernel_size), jnp.float32, -bound, bound)
    b = jax.random.uniform(kb, (out_ch,), jnp.float32, -bound, bound)
    gamma = jnp.ones((out_ch,), jnp.float32)   # BatchNorm1d affine defaults
    beta = jnp.zeros((out_ch,), jnp.float32)
    return {"w": w, "b": b, "gamma": gamma, "beta": beta}


def init_conv_block_params(key, layer_num, in_channels, out_channels, kernel_size):
    keys = jax.random.split(key, layer_num)
    params = []
    for i in range(layer_num - 1):
        params.append(init_conv1d_layer_params(keys[i], in_channels, in_channels, kernel_size))
    params.append(init_conv1d_layer_params(keys[-1], in_channels, out_channels, kernel_size))
    return params


def conv_block_forward(x, params, *, stride=1, dilation=1):
    # layers 0..n-2: in_ch -> in_ch, stride=1, bf16 activations between layers
    # (the next layer consumes bf16 anyway); last layer: in_ch -> out_ch with the
    # requested stride and f32 output.
    for layer_params in params[:-1]:
        x = conv1d_layer_forward(x, layer_params, stride=1, dilation=dilation,
                                 out_dtype=jnp.bfloat16)
    return conv1d_layer_forward(x, params[-1], stride=stride, dilation=dilation,
                                out_dtype=jnp.float32)


# ---------------------------------------------------------------------------
# Pure-JAX reference (PyTorch semantics) for correctness checking
# ---------------------------------------------------------------------------

def _conv1d_layer_reference(x, params, *, stride=1, dilation=1, eps=1e-5):
    w, b = params["w"], params["b"]
    gamma, beta = params["gamma"], params["beta"]
    K = w.shape[-1]
    pad = (K - 1) * dilation
    l_pad = pad // 2
    r_pad = pad - l_pad
    xp = jnp.pad(x, ((0, 0), (0, 0), (l_pad, r_pad)), mode="reflect")
    y = jax.lax.conv_general_dilated(
        xp, w, window_strides=(stride,), padding="VALID",
        rhs_dilation=(dilation,), dimension_numbers=("NCH", "OIH", "NCH"))
    y = y + b[None, :, None]
    mean = jnp.mean(y, axis=(0, 2), keepdims=True)
    var = jnp.mean(jnp.square(y - mean), axis=(0, 2), keepdims=True)
    y = (y - mean) * jax.lax.rsqrt(var + eps)
    y = y * gamma[None, :, None] + beta[None, :, None]
    return jnp.maximum(y, 0.0)


def conv_block_reference(x, params, *, stride=1, dilation=1):
    for layer_params in params[:-1]:
        x = _conv1d_layer_reference(x, layer_params, stride=1, dilation=dilation)
    return _conv1d_layer_reference(x, params[-1], stride=stride, dilation=dilation)


# ---------------------------------------------------------------------------

if __name__ == "__main__":
    key = jax.random.PRNGKey(0)
    k_x, k_p = jax.random.split(key)

    # ConvBlock(dimension=1, layer_num=2, in_channels=4, out_channels=8,
    #           kernel_size=3, stride=1, padding='SAME')
    N, C_in, L = 2, 4, 16
    C_out, K, layer_num, stride = 8, 3, 2, 1

    x = jax.random.normal(k_x, (N, C_in, L), jnp.float32)
    params = init_conv_block_params(k_p, layer_num, C_in, C_out, K)

    fwd = jax.jit(conv_block_forward, static_argnames=("stride", "dilation"))
    out = jax.block_until_ready(fwd(x, params, stride=stride))

    assert out.shape == (N, C_out, L), out.shape
    assert out.dtype == jnp.float32, out.dtype
    assert bool(jnp.all(jnp.isfinite(out)))

    # Check against the pure-JAX f32 reference (loose tolerance: bf16 MXU
    # operands and bf16 inter-layer activations).
    ref = conv_block_reference(x, params, stride=stride)
    err = float(jnp.max(jnp.abs(out - ref)))
    assert err < 1.5e-1, f"max abs error vs reference: {err}"

    print("KERNEL_OK")
</pallas_src>

<mosaic_0001>
module attributes {stable_mosaic.version = 11 : i64} {
  func.func @_fused_conv_bn_relu_kernel(%arg0: i32, %arg1: i32, %arg2: i32, %arg3: memref<1x4x256xbf16, #tpu.memory_space<vmem>>, %arg4: memref<4x12xbf16, #tpu.memory_space<vmem>>, %arg5: memref<4x1xf32, #tpu.memory_space<vmem>>, %arg6: memref<4x1xf32, #tpu.memory_space<vmem>>, %arg7: memref<1x4x128xbf16, #tpu.memory_space<vmem>>, %arg8: memref<4x1xf32, #tpu.memory_space<vmem>>, %arg9: memref<4x1xf32, #tpu.memory_space<vmem>>) attributes {dimension_semantics = [#tpu.dimension_semantics<arbitrary>, #tpu.dimension_semantics<arbitrary>, #tpu.dimension_semantics<arbitrary>], iteration_bounds = array<i64: 2, 2, 1>, scalar_prefetch = 0 : i64, scratch_operands = 2 : i64, tpu.core_type = #tpu.core_type<tc>, window_params = [{transform_indices = @transform_0, window_bounds = array<i64: 1, 4, 256>}, {pipeline_mode = #tpu.pipeline_mode<synchronous>, transform_indices = @transform_1, window_bounds = array<i64: 4, 12>}, {pipeline_mode = #tpu.pipeline_mode<synchronous>, transform_indices = @transform_2, window_bounds = array<i64: 4, 1>}, {pipeline_mode = #tpu.pipeline_mode<synchronous>, transform_indices = @transform_3, window_bounds = array<i64: 4, 1>}, {transform_indices = @transform_4, window_bounds = array<i64: 1, 4, 128>}]} {
    %c0_i32 = arith.constant 0 : i32
    %0 = arith.cmpi eq, %arg0, %c0_i32 : i32
    %c0_i32_0 = arith.constant 0 : i32
    %1 = arith.cmpi eq, %arg1, %c0_i32_0 : i32
    %2 = arith.andi %0, %1 : i1
    %c0_i32_1 = arith.constant 0 : i32
    %3 = arith.cmpi eq, %arg2, %c0_i32_1 : i32
    %4 = arith.andi %2, %3 : i1
    %5 = arith.extui %4 : i1 to i32
    %c0_i32_2 = arith.constant 0 : i32
    %6 = arith.cmpi ne, %5, %c0_i32_2 : i32
    scf.if %6 {
      %cst_9 = arith.constant 0.000000e+00 : f32
      %24 = vector.broadcast %cst_9 : f32 to vector<4x1xf32>
      %c0_10 = arith.constant 0 : index
      %c0_11 = arith.constant 0 : index
      %25 = vector.load %arg8[%c0_10, %c0_11] : memref<4x1xf32, #tpu.memory_space<vmem>>, vector<4x1xf32>
      tpu.vector_store %arg8[%c0_10, %c0_11], %24 {strides = array<i32>} : memref<4x1xf32, #tpu.memory_space<vmem>>, vector<4x1xf32>,
      %cst_12 = arith.constant 0.000000e+00 : f32
      %26 = vector.broadcast %cst_12 : f32 to vector<4x1xf32>
      %c0_13 = arith.constant 0 : index
      %c0_14 = arith.constant 0 : index
      %27 = vector.load %arg9[%c0_13, %c0_14] : memref<4x1xf32, #tpu.memory_space<vmem>>, vector<4x1xf32>
      tpu.vector_store %arg9[%c0_13, %c0_14], %26 {strides = array<i32>} : memref<4x1xf32, #tpu.memory_space<vmem>>, vector<4x1xf32>,
    } else {
    }
    %c128_i32 = arith.constant 128 : i32
    %7 = arith.muli %arg2, %c128_i32 : i32
    %8 = tpu.assume_multiple %7, 128 : i32
    %c0 = arith.constant 0 : index
    %c0_3 = arith.constant 0 : index
    %9 = arith.index_cast %8 : i32 to index
    %10 = vector.load %arg3[%c0, %c0_3, %9] : memref<1x4x256xbf16, #tpu.memory_space<vmem>>, vector<1x4x130xbf16>
    %11 = vector.shape_cast %10 : vector<1x4x130xbf16> to vector<4x130xbf16>
    %12 = vector.extract_strided_slice %11 {offsets = [0, 0], sizes = [4, 128], strides = [1, 1]} : vector<4x130xbf16> to vector<4x128xbf16>
    %13 = vector.extract_strided_slice %11 {offsets = [0, 1], sizes = [4, 128], strides = [1, 1]} : vector<4x130xbf16> to vector<4x128xbf16>
    %14 = vector.extract_strided_slice %11 {offsets = [0, 2], sizes = [4, 128], strides = [1, 1]} : vector<4x130xbf16> to vector<4x128xbf16>
    %15 = tpu.concatenate %12, %13, %14 in 0 : vector<4x128xbf16>, vector<4x128xbf16>, vector<4x128xbf16> -> vector<12x128xbf16>
    %c0_4 = arith.constant 0 : index
    %c0_5 = arith.constant 0 : index
    %16 = vector.load %arg4[%c0_4, %c0_5] : memref<4x12xbf16, #tpu.memory_space<vmem>>, vector<4x12xbf16>
    %cst = arith.constant dense<0.000000e+00> : vector<4x128xf32>
    %17 = tpu.matmul %16, %15, %cst {dimension_numbers = #tpu.dot_dimension_numbers<[1], [0], [0], [1], [0, 0, 1, 1], [], []>} : vector<4x12xbf16>, vector<12x128xbf16>, vector<4x128xf32> -> vector<4x128xf32>
    %c0_i32_6 = arith.constant 0 : i32
    %18 = arith.cmpi eq, %arg0, %c0_i32_6 : i32
    %19 = arith.extui %18 : i1 to i32
    %c0_i32_7 = arith.constant 0 : i32
    %20 = arith.cmpi ne, %19, %c0_i32_7 : i32
    scf.if %20 {
      %c0_i32_9 = arith.constant 0 : i32
      %24 = arith.cmpi ne, %arg2, %c0_i32_9 : i32
      %25 = arith.extui %24 : i1 to i32
      %c0_i32_10 = arith.constant 0 : i32
      %26 = arith.cmpi ne, %25, %c0_i32_10 : i32
      scf.if %26 {
        %c0_13 = arith.constant 0 : index
        %c0_14 = arith.constant 0 : index
        %30 = vector.load %arg8[%c0_13, %c0_14] : memref<4x1xf32, #tpu.memory_space<vmem>>, vector<4x1xf32>
        %cst_15 = arith.constant dense<0.000000e+00> : vector<4xf32>
        %31 = vector.multi_reduction <add>, %17, %cst_15 [1] : vector<4x128xf32> to vector<4xf32>
        %32 = vector.shape_cast %31 : vector<4xf32> to vector<4x1xf32>
        %33 = arith.addf %30, %32 : vector<4x1xf32>
        %c0_16 = arith.constant 0 : index
        %c0_17 = arith.constant 0 : index
        %34 = vector.load %arg8[%c0_16, %c0_17] : memref<4x1xf32, #tpu.memory_space<vmem>>, vector<4x1xf32>
        tpu.vector_store %arg8[%c0_16, %c0_17], %33 {strides = array<i32>} : memref<4x1xf32, #tpu.memory_space<vmem>>, vector<4x1xf32>,
        %c0_18 = arith.constant 0 : index
        %c0_19 = arith.constant 0 : index
        %35 = vector.load %arg9[%c0_18, %c0_19] : memref<4x1xf32, #tpu.memory_space<vmem>>, vector<4x1xf32>
        %36 = arith.mulf %17, %17 : vector<4x128xf32>
        %cst_20 = arith.constant dense<0.000000e+00> : vector<4xf32>
        %37 = vector.multi_reduction <add>, %36, %cst_20 [1] : vector<4x128xf32> to vector<4xf32>
        %38 = vector.shape_cast %37 : vector<4xf32> to vector<4x1xf32>
        %39 = arith.addf %35, %38 : vector<4x1xf32>
        %c0_21 = arith.constant 0 : index
        %c0_22 = arith.constant 0 : index
        %40 = vector.load %arg9[%c0_21, %c0_22] : memref<4x1xf32, #tpu.memory_space<vmem>>, vector<4x1xf32>
        tpu.vector_store %arg9[%c0_21, %c0_22], %39 {strides = array<i32>} : memref<4x1xf32, #tpu.memory_space<vmem>>, vector<4x1xf32>,
      } else {
      }
      %c0_i32_11 = arith.constant 0 : i32
      %27 = arith.cmpi eq, %arg2, %c0_i32_11 : i32
      %28 = arith.extui %27 : i1 to i32
      %c0_i32_12 = arith.constant 0 : i32
      %29 = arith.cmpi ne, %28, %c0_i32_12 : i32
      scf.if %29 {
        %30 = tpu.iota {dimensions = array<i32: 1>} : vector<4x128xi32>
        %c128_i32_13 = arith.constant 128 : i32
        %31 = arith.muli %arg2, %c128_i32_13 : i32
        %32 = vector.broadcast %31 : i32 to vector<4x128xi32>
        %33 = arith.addi %30, %32 : vector<4x128xi32>
        %c16_i32 = arith.constant 16 : i32
        %34 = vector.broadcast %c16_i32 : i32 to vector<4x128xi32>
        %35 = arith.cmpi slt, %33, %34 : vector<4x128xi32>
        %cst_14 = arith.constant 0.000000e+00 : f32
        %36 = vector.broadcast %cst_14 : f32 to vector<4x128xf32>
        %37 = arith.select %35, %17, %36 : vector<4x128xi1>, vector<4x128xf32>
        %c0_15 = arith.constant 0 : index
        %c0_16 = arith.constant 0 : index
        %38 = vector.load %arg8[%c0_15, %c0_16] : memref<4x1xf32, #tpu.memory_space<vmem>>, vector<4x1xf32>
        %cst_17 = arith.constant dense<0.000000e+00> : vector<4xf32>
        %39 = vector.multi_reduction <add>, %37, %cst_17 [1] : vector<4x128xf32> to vector<4xf32>
        %40 = vector.shape_cast %39 : vector<4xf32> to vector<4x1xf32>
        %41 = arith.addf %38, %40 : vector<4x1xf32>
        %c0_18 = arith.constant 0 : index
        %c0_19 = arith.constant 0 : index
        %42 = vector.load %arg8[%c0_18, %c0_19] : memref<4x1xf32, #tpu.memory_space<vmem>>, vector<4x1xf32>
        tpu.vector_store %arg8[%c0_18, %c0_19], %41 {strides = array<i32>} : memref<4x1xf32, #tpu.memory_space<vmem>>, vector<4x1xf32>,
        %c0_20 = arith.constant 0 : index
        %c0_21 = arith.constant 0 : index
        %43 = vector.load %arg9[%c0_20, %c0_21] : memref<4x1xf32, #tpu.memory_space<vmem>>, vector<4x1xf32>
        %44 = arith.mulf %37, %37 : vector<4x128xf32>
        %cst_22 = arith.constant dense<0.000000e+00> : vector<4xf32>
        %45 = vector.multi_reduction <add>, %44, %cst_22 [1] : vector<4x128xf32> to vector<4xf32>
        %46 = vector.shape_cast %45 : vector<4xf32> to vector<4x1xf32>
        %47 = arith.addf %43, %46 : vector<4x1xf32>
        %c0_23 = arith.constant 0 : index
        %c0_24 = arith.constant 0 : index
        %48 = vector.load %arg9[%c0_23, %c0_24] : memref<4x1xf32, #tpu.memory_space<vmem>>, vector<4x1xf32>
        tpu.vector_store %arg9[%c0_23, %c0_24], %47 {strides = array<i32>} : memref<4x1xf32, #tpu.memory_space<vmem>>, vector<4x1xf32>,
      } else {
      }
    } else {
    }
    %c1_i32 = arith.constant 1 : i32
    %21 = arith.cmpi eq, %arg0, %c1_i32 : i32
    %22 = arith.extui %21 : i1 to i32
    %c0_i32_8 = arith.constant 0 : i32
    %23 = arith.cmpi ne, %22, %c0_i32_8 : i32
    scf.if %23 {
      %c0_9 = arith.constant 0 : index
      %c0_10 = arith.constant 0 : index
      %24 = vector.load %arg8[%c0_9, %c0_10] : memref<4x1xf32, #tpu.memory_space<vmem>>, vector<4x1xf32>
      %cst_11 = arith.constant 3.125000e-02 : f32
      %25 = vector.broadcast %cst_11 : f32 to vector<4x1xf32>
      %26 = arith.mulf %24, %25 : vector<4x1xf32>
      %c0_12 = arith.constant 0 : index
      %c0_13 = arith.constant 0 : index
      %27 = vector.load %arg9[%c0_12, %c0_13] : memref<4x1xf32, #tpu.memory_space<vmem>>, vector<4x1xf32>
      %cst_14 = arith.constant 3.125000e-02 : f32
      %28 = vector.broadcast %cst_14 : f32 to vector<4x1xf32>
      %29 = arith.mulf %27, %28 : vector<4x1xf32>
      %30 = arith.mulf %26, %26 : vector<4x1xf32>
      %31 = arith.subf %29, %30 : vector<4x1xf32>
      %cst_15 = arith.constant 9.99999974E-6 : f32
      %32 = vector.broadcast %cst_15 : f32 to vector<4x1xf32>
      %33 = arith.addf %31, %32 : vector<4x1xf32>
      %34 = math.rsqrt %33 : vector<4x1xf32>
      %c0_16 = arith.constant 0 : index
      %c0_17 = arith.constant 0 : index
      %35 = vector.load %arg5[%c0_16, %c0_17] : memref<4x1xf32, #tpu.memory_space<vmem>>, vector<4x1xf32>
      %36 = arith.mulf %35, %34 : vector<4x1xf32>
      %c0_18 = arith.constant 0 : index
      %c0_19 = arith.constant 0 : index
      %37 = vector.load %arg6[%c0_18, %c0_19] : memref<4x1xf32, #tpu.memory_space<vmem>>, vector<4x1xf32>
      %38 = arith.mulf %26, %36 : vector<4x1xf32>
      %39 = arith.subf %37, %38 : vector<4x1xf32>
      %40 = vector.broadcast %36 : vector<4x1xf32> to vector<4x128xf32>
      %41 = arith.mulf %17, %40 : vector<4x128xf32>
      %42 = vector.broadcast %39 : vector<4x1xf32> to vector<4x128xf32>
      %43 = arith.addf %41, %42 : vector<4x128xf32>
      %cst_20 = arith.constant 0.000000e+00 : f32
      %44 = vector.broadcast %cst_20 : f32 to vector<4x128xf32>
      %45 = arith.maximumf %43, %44 : vector<4x128xf32>
      %46 = arith.truncf %45 : vector<4x128xf32> to vector<4x128xbf16>
      %c0_21 = arith.constant 0 : index
      %c0_22 = arith.constant 0 : index
      %c0_23 = arith.constant 0 : index
      %47 = vector.load %arg7[%c0_21, %c0_22, %c0_23] : memref<1x4x128xbf16, #tpu.memory_space<vmem>>, vector<1x4x128xbf16>
      %48 = vector.shape_cast %47 : vector<1x4x128xbf16> to vector<4x128xbf16>
      %49 = vector.shape_cast %46 : vector<4x128xbf16> to vector<1x4x128xbf16>
      tpu.vector_store %arg7[%c0_21, %c0_22, %c0_23], %49 {strides = array<i32>} : memref<1x4x128xbf16, #tpu.memory_space<vmem>>, vector<1x4x128xbf16>,
    } else {
    }
    return
  }
  func.func @transform_0(%arg0: i32, %arg1: i32, %arg2: i32) -> (i32, i32, i32) {
    %c0_i32 = arith.constant 0 : i32
    %c0_i32_0 = arith.constant 0 : i32
    %c0_i32_1 = arith.constant 0 : i32
    return %arg1, %c0_i32, %c0_i32_0 : i32, i32, i32
  }
  func.func @transform_1(%arg0: i32, %arg1: i32, %arg2: i32) -> (i32, i32) {
    %c0_i32 = arith.constant 0 : i32
    %c0_i32_0 = arith.constant 0 : i32
    %c0_i32_1 = arith.constant 0 : i32
    return %c0_i32, %c0_i32_0 : i32, i32
  }
  func.func @transform_2(%arg0: i32, %arg1: i32, %arg2: i32) -> (i32, i32) {
    %c0_i32 = arith.constant 0 : i32
    %c0_i32_0 = arith.constant 0 : i32
    %c0_i32_1 = arith.constant 0 : i32
    return %c0_i32, %c0_i32_0 : i32, i32
  }
  func.func @transform_3(%arg0: i32, %arg1: i32, %arg2: i32) -> (i32, i32) {
    %c0_i32 = arith.constant 0 : i32
    %c0_i32_0 = arith.constant 0 : i32
    %c0_i32_1 = arith.constant 0 : i32
    return %c0_i32, %c0_i32_0 : i32, i32
  }
  func.func @transform_4(%arg0: i32, %arg1: i32, %arg2: i32) -> (i32, i32, i32) {
    %0 = arith.muli %arg1, %arg0 : i32
    %1 = arith.muli %arg2, %arg0 : i32
    %c0_i32 = arith.constant 0 : i32
    %c0_i32_0 = arith.constant 0 : i32
    return %0, %c0_i32, %1 : i32, i32, i32
  }
}

module attributes {stable_mosaic.version = 11 : i64} {
  func.func @_fused_conv_bn_relu_kernel(%arg0: i32, %arg1: i32, %arg2: i32, %arg3: memref<1x4x256xbf16, #tpu.memory_space<vmem>>, %arg4: memref<8x12xbf16, #tpu.memory_space<vmem>>, %arg5: memref<8x1xf32, #tpu.memory_space<vmem>>, %arg6: memref<8x1xf32, #tpu.memory_space<vmem>>, %arg7: memref<1x8x128xf32, #tpu.memory_space<vmem>>, %arg8: memref<8x1xf32, #tpu.memory_space<vmem>>, %arg9: memref<8x1xf32, #tpu.memory_space<vmem>>) attributes {dimension_semantics = [#tpu.dimension_semantics<arbitrary>, #tpu.dimension_semantics<arbitrary>, #tpu.dimension_semantics<arbitrary>], iteration_bounds = array<i64: 2, 2, 1>, scalar_prefetch = 0 : i64, scratch_operands = 2 : i64, tpu.core_type = #tpu.core_type<tc>, window_params = [{transform_indices = @transform_0, window_bounds = array<i64: 1, 4, 256>}, {pipeline_mode = #tpu.pipeline_mode<synchronous>, transform_indices = @transform_1, window_bounds = array<i64: 8, 12>}, {pipeline_mode = #tpu.pipeline_mode<synchronous>, transform_indices = @transform_2, window_bounds = array<i64: 8, 1>}, {pipeline_mode = #tpu.pipeline_mode<synchronous>, transform_indices = @transform_3, window_bounds = array<i64: 8, 1>}, {transform_indices = @transform_4, window_bounds = array<i64: 1, 8, 128>}]} {
    %c0_i32 = arith.constant 0 : i32
    %0 = arith.cmpi eq, %arg0, %c0_i32 : i32
    %c0_i32_0 = arith.constant 0 : i32
    %1 = arith.cmpi eq, %arg1, %c0_i32_0 : i32
    %2 = arith.andi %0, %1 : i1
    %c0_i32_1 = arith.constant 0 : i32
    %3 = arith.cmpi eq, %arg2, %c0_i32_1 : i32
    %4 = arith.andi %2, %3 : i1
    %5 = arith.extui %4 : i1 to i32
    %c0_i32_2 = arith.constant 0 : i32
    %6 = arith.cmpi ne, %5, %c0_i32_2 : i32
    scf.if %6 {
      %cst_9 = arith.constant 0.000000e+00 : f32
      %24 = vector.broadcast %cst_9 : f32 to vector<8x1xf32>
      %c0_10 = arith.constant 0 : index
      %c0_11 = arith.constant 0 : index
      %25 = vector.load %arg8[%c0_10, %c0_11] : memref<8x1xf32, #tpu.memory_space<vmem>>, vector<8x1xf32>
      tpu.vector_store %arg8[%c0_10, %c0_11], %24 {strides = array<i32>} : memref<8x1xf32, #tpu.memory_space<vmem>>, vector<8x1xf32>,
      %cst_12 = arith.constant 0.000000e+00 : f32
      %26 = vector.broadcast %cst_12 : f32 to vector<8x1xf32>
      %c0_13 = arith.constant 0 : index
      %c0_14 = arith.constant 0 : index
      %27 = vector.load %arg9[%c0_13, %c0_14] : memref<8x1xf32, #tpu.memory_space<vmem>>, vector<8x1xf32>
      tpu.vector_store %arg9[%c0_13, %c0_14], %26 {strides = array<i32>} : memref<8x1xf32, #tpu.memory_space<vmem>>, vector<8x1xf32>,
    } else {
    }
    %c128_i32 = arith.constant 128 : i32
    %7 = arith.muli %arg2, %c128_i32 : i32
    %8 = tpu.assume_multiple %7, 128 : i32
    %c0 = arith.constant 0 : index
    %c0_3 = arith.constant 0 : index
    %9 = arith.index_cast %8 : i32 to index
    %10 = vector.load %arg3[%c0, %c0_3, %9] : memref<1x4x256xbf16, #tpu.memory_space<vmem>>, vector<1x4x130xbf16>
    %11 = vector.shape_cast %10 : vector<1x4x130xbf16> to vector<4x130xbf16>
    %12 = vector.extract_strided_slice %11 {offsets = [0, 0], sizes = [4, 128], strides = [1, 1]} : vector<4x130xbf16> to vector<4x128xbf16>
    %13 = vector.extract_strided_slice %11 {offsets = [0, 1], sizes = [4, 128], strides = [1, 1]} : vector<4x130xbf16> to vector<4x128xbf16>
    %14 = vector.extract_strided_slice %11 {offsets = [0, 2], sizes = [4, 128], strides = [1, 1]} : vector<4x130xbf16> to vector<4x128xbf16>
    %15 = tpu.concatenate %12, %13, %14 in 0 : vector<4x128xbf16>, vector<4x128xbf16>, vector<4x128xbf16> -> vector<12x128xbf16>
    %c0_4 = arith.constant 0 : index
    %c0_5 = arith.constant 0 : index
    %16 = vector.load %arg4[%c0_4, %c0_5] : memref<8x12xbf16, #tpu.memory_space<vmem>>, vector<8x12xbf16>
    %cst = arith.constant dense<0.000000e+00> : vector<8x128xf32>
    %17 = tpu.matmul %16, %15, %cst {dimension_numbers = #tpu.dot_dimension_numbers<[1], [0], [0], [1], [0, 0, 1, 1], [], []>} : vector<8x12xbf16>, vector<12x128xbf16>, vector<8x128xf32> -> vector<8x128xf32>
    %c0_i32_6 = arith.constant 0 : i32
    %18 = arith.cmpi eq, %arg0, %c0_i32_6 : i32
    %19 = arith.extui %18 : i1 to i32
    %c0_i32_7 = arith.constant 0 : i32
    %20 = arith.cmpi ne, %19, %c0_i32_7 : i32
    scf.if %20 {
      %c0_i32_9 = arith.constant 0 : i32
      %24 = arith.cmpi ne, %arg2, %c0_i32_9 : i32
      %25 = arith.extui %24 : i1 to i32
      %c0_i32_10 = arith.constant 0 : i32
      %26 = arith.cmpi ne, %25, %c0_i32_10 : i32
      scf.if %26 {
        %c0_13 = arith.constant 0 : index
        %c0_14 = arith.constant 0 : index
        %30 = vector.load %arg8[%c0_13, %c0_14] : memref<8x1xf32, #tpu.memory_space<vmem>>, vector<8x1xf32>
        %cst_15 = arith.constant dense<0.000000e+00> : vector<8xf32>
        %31 = vector.multi_reduction <add>, %17, %cst_15 [1] : vector<8x128xf32> to vector<8xf32>
        %32 = vector.shape_cast %31 : vector<8xf32> to vector<8x1xf32>
        %33 = arith.addf %30, %32 : vector<8x1xf32>
        %c0_16 = arith.constant 0 : index
        %c0_17 = arith.constant 0 : index
        %34 = vector.load %arg8[%c0_16, %c0_17] : memref<8x1xf32, #tpu.memory_space<vmem>>, vector<8x1xf32>
        tpu.vector_store %arg8[%c0_16, %c0_17], %33 {strides = array<i32>} : memref<8x1xf32, #tpu.memory_space<vmem>>, vector<8x1xf32>,
        %c0_18 = arith.constant 0 : index
        %c0_19 = arith.constant 0 : index
        %35 = vector.load %arg9[%c0_18, %c0_19] : memref<8x1xf32, #tpu.memory_space<vmem>>, vector<8x1xf32>
        %36 = arith.mulf %17, %17 : vector<8x128xf32>
        %cst_20 = arith.constant dense<0.000000e+00> : vector<8xf32>
        %37 = vector.multi_reduction <add>, %36, %cst_20 [1] : vector<8x128xf32> to vector<8xf32>
        %38 = vector.shape_cast %37 : vector<8xf32> to vector<8x1xf32>
        %39 = arith.addf %35, %38 : vector<8x1xf32>
        %c0_21 = arith.constant 0 : index
        %c0_22 = arith.constant 0 : index
        %40 = vector.load %arg9[%c0_21, %c0_22] : memref<8x1xf32, #tpu.memory_space<vmem>>, vector<8x1xf32>
        tpu.vector_store %arg9[%c0_21, %c0_22], %39 {strides = array<i32>} : memref<8x1xf32, #tpu.memory_space<vmem>>, vector<8x1xf32>,
      } else {
      }
      %c0_i32_11 = arith.constant 0 : i32
      %27 = arith.cmpi eq, %arg2, %c0_i32_11 : i32
      %28 = arith.extui %27 : i1 to i32
      %c0_i32_12 = arith.constant 0 : i32
      %29 = arith.cmpi ne, %28, %c0_i32_12 : i32
      scf.if %29 {
        %30 = tpu.iota {dimensions = array<i32: 1>} : vector<8x128xi32>
        %c128_i32_13 = arith.constant 128 : i32
        %31 = arith.muli %arg2, %c128_i32_13 : i32
        %32 = vector.broadcast %31 : i32 to vector<8x128xi32>
        %33 = arith.addi %30, %32 : vector<8x128xi32>
        %c16_i32 = arith.constant 16 : i32
        %34 = vector.broadcast %c16_i32 : i32 to vector<8x128xi32>
        %35 = arith.cmpi slt, %33, %34 : vector<8x128xi32>
        %cst_14 = arith.constant 0.000000e+00 : f32
        %36 = vector.broadcast %cst_14 : f32 to vector<8x128xf32>
        %37 = arith.select %35, %17, %36 : vector<8x128xi1>, vector<8x128xf32>
        %c0_15 = arith.constant 0 : index
        %c0_16 = arith.constant 0 : index
        %38 = vector.load %arg8[%c0_15, %c0_16] : memref<8x1xf32, #tpu.memory_space<vmem>>, vector<8x1xf32>
        %cst_17 = arith.constant dense<0.000000e+00> : vector<8xf32>
        %39 = vector.multi_reduction <add>, %37, %cst_17 [1] : vector<8x128xf32> to vector<8xf32>
        %40 = vector.shape_cast %39 : vector<8xf32> to vector<8x1xf32>
        %41 = arith.addf %38, %40 : vector<8x1xf32>
        %c0_18 = arith.constant 0 : index
        %c0_19 = arith.constant 0 : index
        %42 = vector.load %arg8[%c0_18, %c0_19] : memref<8x1xf32, #tpu.memory_space<vmem>>, vector<8x1xf32>
        tpu.vector_store %arg8[%c0_18, %c0_19], %41 {strides = array<i32>} : memref<8x1xf32, #tpu.memory_space<vmem>>, vector<8x1xf32>,
        %c0_20 = arith.constant 0 : index
        %c0_21 = arith.constant 0 : index
        %43 = vector.load %arg9[%c0_20, %c0_21] : memref<8x1xf32, #tpu.memory_space<vmem>>, vector<8x1xf32>
        %44 = arith.mulf %37, %37 : vector<8x128xf32>
        %cst_22 = arith.constant dense<0.000000e+00> : vector<8xf32>
        %45 = vector.multi_reduction <add>, %44, %cst_22 [1] : vector<8x128xf32> to vector<8xf32>
        %46 = vector.shape_cast %45 : vector<8xf32> to vector<8x1xf32>
        %47 = arith.addf %43, %46 : vector<8x1xf32>
        %c0_23 = arith.constant 0 : index
        %c0_24 = arith.constant 0 : index
        %48 = vector.load %arg9[%c0_23, %c0_24] : memref<8x1xf32, #tpu.memory_space<vmem>>, vector<8x1xf32>
        tpu.vector_store %arg9[%c0_23, %c0_24], %47 {strides = array<i32>} : memref<8x1xf32, #tpu.memory_space<vmem>>, vector<8x1xf32>,
      } else {
      }
    } else {
    }
    %c1_i32 = arith.constant 1 : i32
    %21 = arith.cmpi eq, %arg0, %c1_i32 : i32
    %22 = arith.extui %21 : i1 to i32
    %c0_i32_8 = arith.constant 0 : i32
    %23 = arith.cmpi ne, %22, %c0_i32_8 : i32
    scf.if %23 {
      %c0_9 = arith.constant 0 : index
      %c0_10 = arith.constant 0 : index
      %24 = vector.load %arg8[%c0_9, %c0_10] : memref<8x1xf32, #tpu.memory_space<vmem>>, vector<8x1xf32>
      %cst_11 = arith.constant 3.125000e-02 : f32
      %25 = vector.broadcast %cst_11 : f32 to vector<8x1xf32>
      %26 = arith.mulf %24, %25 : vector<8x1xf32>
      %c0_12 = arith.constant 0 : index
      %c0_13 = arith.constant 0 : index
      %27 = vector.load %arg9[%c0_12, %c0_13] : memref<8x1xf32, #tpu.memory_space<vmem>>, vector<8x1xf32>
      %cst_14 = arith.constant 3.125000e-02 : f32
      %28 = vector.broadcast %cst_14 : f32 to vector<8x1xf32>
      %29 = arith.mulf %27, %28 : vector<8x1xf32>
      %30 = arith.mulf %26, %26 : vector<8x1xf32>
      %31 = arith.subf %29, %30 : vector<8x1xf32>
      %cst_15 = arith.constant 9.99999974E-6 : f32
      %32 = vector.broadcast %cst_15 : f32 to vector<8x1xf32>
      %33 = arith.addf %31, %32 : vector<8x1xf32>
      %34 = math.rsqrt %33 : vector<8x1xf32>
      %c0_16 = arith.constant 0 : index
      %c0_17 = arith.constant 0 : index
      %35 = vector.load %arg5[%c0_16, %c0_17] : memref<8x1xf32, #tpu.memory_space<vmem>>, vector<8x1xf32>
      %36 = arith.mulf %35, %34 : vector<8x1xf32>
      %c0_18 = arith.constant 0 : index
      %c0_19 = arith.constant 0 : index
      %37 = vector.load %arg6[%c0_18, %c0_19] : memref<8x1xf32, #tpu.memory_space<vmem>>, vector<8x1xf32>
      %38 = arith.mulf %26, %36 : vector<8x1xf32>
      %39 = arith.subf %37, %38 : vector<8x1xf32>
      %40 = vector.broadcast %36 : vector<8x1xf32> to vector<8x128xf32>
      %41 = arith.mulf %17, %40 : vector<8x128xf32>
      %42 = vector.broadcast %39 : vector<8x1xf32> to vector<8x128xf32>
      %43 = arith.addf %41, %42 : vector<8x128xf32>
      %cst_20 = arith.constant 0.000000e+00 : f32
      %44 = vector.broadcast %cst_20 : f32 to vector<8x128xf32>
      %45 = arith.maximumf %43, %44 : vector<8x128xf32>
      %c0_21 = arith.constant 0 : index
      %c0_22 = arith.constant 0 : index
      %c0_23 = arith.constant 0 : index
      %46 = vector.load %arg7[%c0_21, %c0_22, %c0_23] : memref<1x8x128xf32, #tpu.memory_space<vmem>>, vector<1x8x128xf32>
      %47 = vector.shape_cast %46 : vector<1x8x128xf32> to vector<8x128xf32>
      %48 = vector.shape_cast %45 : vector<8x128xf32> to vector<1x8x128xf32>
      tpu.vector_store %arg7[%c0_21, %c0_22, %c0_23], %48 {strides = array<i32>} : memref<1x8x128xf32, #tpu.memory_space<vmem>>, vector<1x8x128xf32>,
    } else {
    }
    return
  }
  func.func @transform_0(%arg0: i32, %arg1: i32, %arg2: i32) -> (i32, i32, i32) {
    %c0_i32 = arith.constant 0 : i32
    %c0_i32_0 = arith.constant 0 : i32
    %c0_i32_1 = arith.constant 0 : i32
    return %arg1, %c0_i32, %c0_i32_0 : i32, i32, i32
  }
  func.func @transform_1(%arg0: i32, %arg1: i32, %arg2: i32) -> (i32, i32) {
    %c0_i32 = arith.constant 0 : i32
    %c0_i32_0 = arith.constant 0 : i32
    %c0_i32_1 = arith.constant 0 : i32
    return %c0_i32, %c0_i32_0 : i32, i32
  }
  func.func @transform_2(%arg0: i32, %arg1: i32, %arg2: i32) -> (i32, i32) {
    %c0_i32 = arith.constant 0 : i32
    %c0_i32_0 = arith.constant 0 : i32
    %c0_i32_1 = arith.constant 0 : i32
    return %c0_i32, %c0_i32_0 : i32, i32
  }
  func.func @transform_3(%arg0: i32, %arg1: i32, %arg2: i32) -> (i32, i32) {
    %c0_i32 = arith.constant 0 : i32
    %c0_i32_0 = arith.constant 0 : i32
    %c0_i32_1 = arith.constant 0 : i32
    return %c0_i32, %c0_i32_0 : i32, i32
  }
  func.func @transform_4(%arg0: i32, %arg1: i32, %arg2: i32) -> (i32, i32, i32) {
    %0 = arith.muli %arg1, %arg0 : i32
    %1 = arith.muli %arg2, %arg0 : i32
    %c0_i32 = arith.constant 0 : i32
    %c0_i32_0 = arith.constant 0 : i32
    return %0, %c0_i32, %1 : i32, i32, i32
  }
}

</mosaic_0001>

<bundles_post_ra>
// kernel: conv_block_forward.3
= control target key start
LH: loop header
LB: loop body
LE: loop exit
PB: predicated region body
PF: predicated region fallthrough
CT: control target
= control target key end

     0   :  { %9 = vsyncpa [#allocation5], 0  ;;  %s879_s0 = inlined_call_operand.vmem [shape: bf16[2,4,256], index: 0, kind: input, shape index: {}]   ;;  %s880_s1 = inlined_call_operand.vmem [shape: bf16[8,12], index: 1, kind: input, shape index: {}]   ;;  %s881_s2 = inlined_call_operand.vmem [shape: f32[8,1], index: 2, kind: input, shape index: {}]   ;;  %s882_s3 = inlined_call_operand.vmem [shape: f32[8,1], index: 3, kind: input, shape index: {}]   ;;  %s883_s4 = inlined_call_operand.hbm [shape: f32[2,8,128], index: 4, kind: output, shape index: {}]  }
   0x1   :  { %11 = vsyncpa [#allocation5 + $0x1], 0  ;;  %s727_s15 = smov 0   ;;  %s729_s16 = smov 0  }
   0x2   :  { %s731_s17 = smov 0   ;;  %s733_s18 = smov 0  }
   0x3   :  { %s735_s19 = smov 0   ;;  %s737_s20 = smov 0  }
   0x4   :  { %s739_s21 = smov 0   ;;  %s741_s22 = smov 0  }
   0x5 LB: > { %s491_s23 = sadd.s32 4294967295, %s692_s22   ;;  %s492_s24 = sadd.s32 4294967294, %s692_s22   ;;  %s692_s22 = sphi %s741_s22, %s17_s22   ;;  %s688_s21 = sphi %s739_s21, %s892_s21   ;;  %s684_s20 = sphi %s737_s20, %s891_s20   ;;  %s680_s19 = sphi %s735_s19, %s890_s19   ;;  %s676_s18 = sphi %s733_s18, %s889_s18   ;;  %s672_s17 = sphi %s731_s17, %s888_s17   ;;  %s668_s16 = sphi %s729_s16, %s887_s16   ;;  %s664_s15 = sphi %s727_s15, %s886_s15  }
   0x6   : > { %s32_s25 = sadd.s32 1, %s684_s20  ;;  %s36_s26 = sadd.s32 1, %s688_s21 }
   0x7   : > { %p34_p0 = scmp.ge.s32.totalorder %s32_s25, 2  ;;  %s129_s27 = smul.u32 %s684_s20, %s688_s21 }
   0x8   : > { %p148_p1 = scmp.ne.s32.totalorder %s672_s17, %s668_s16  ;;  %p149_p2 = scmp.eq.s32.totalorder %s491_s23, 3 }
   0x9   : > { %s894_s25 = smov (%p34_p0, %s32_s25), 0  ;;  %s896_s26 = smov (!%p34_p0, %s36_s26), %s688_s21 }
   0xa   : > { %p154_p3 = scmp.ne.s32.totalorder %s668_s16, %s664_s15  ;;  %p38_p4 = scmp.ge.s32.totalorder %s896_s26, 2 }
   0xb   : > { %p155_p5 = scmp.eq.s32.totalorder %s492_s24, 3  ;;  %p780_p6 = por %p149_p2, %p148_p1 }
   0xc   : > { %p495_p7 = scmp.ge.s32.totalorder %s692_s22, 1  ;;  %s898_s26 = smov (%p38_p4, %s896_s26), 0 }
   0xd   : > { %p787_p8 = por %p155_p5, %p154_p3  ;;  %p190_p9 = scmp.lt.s32.totalorder %s692_s22, 5 }
   0xe   : > { %s131_s30 = smul.u32 %s898_s26, %s894_s25  ;;  %s138_s6 = sadd.s32 1, %s672_s17 }
   0xf   : > { %p191_p10 = pnand %p495_p7, %p190_p9 }
  0x10   : > { %s133_s5 = ssub.s32 %s129_s27, %s131_s30  ;;  %s213_s8 = sand.u32 (!%p191_p10), 1, %s668_s16  }
  0x11   : > { %p136_p11 = scmp.eq.s32.totalorder %s133_s5, 0  ;;  %194 = sbr.rel (%p191_p10) target bundleno = 718 (0x2ce), region = 36 }
  0x12   : > { %p216_p12 = scmp.lt.s32.totalorder (!%p191_p10), %s676_s18, 1  ;;  %s802_s9 = sshll.u32 (!%p191_p10), %s213_s8, 3 }
  0x13   : > { %s796_s7 = scalar_select %p136_p11, %s672_s17, %s138_s6  }
  0x14   : > { %p224_p13 = scmp.eq.s32.totalorder (!%p191_p10), %s680_s19, 0  ;;  %p225_p0 = scmp.eq.s32.totalorder (!%p191_p10), %s676_s18, 0 }
  0x15   : > { %s215_s23 = scalar_lea.vmem (!%p191_p10), [#allocation4], %s802_s9 }
  0x16   : > { %p226_p1 = pnand (!%p191_p10), %p225_p0, %p224_p13 }
  0x18   : > { %s217_s10 = scalar_select %p216_p12, %s676_s18, 1 }
  0x19   : > { %232 = sbr.rel (%p226_p1) target bundleno = 32 (0x20), region = 40  ;;  %vm233_vm0 = vcmask (!%p226_p1), 7168   ;;  %v694_v0 = vmov (!%p226_p1), 0.0  }
  0x1a   : > { %s507_s11 = sshll.u32 %s217_s10, 2  ;;  %234 = vst.msk [vmem:[#allocation2] sm:$0xff] (!%p226_p1), %vm233_vm0, %v694_v0  ;;  %235 = vst.msk [vmem:[#allocation3] sm:$0xff] (!%p226_p1), %vm233_vm0, %v694_v0 }
  0x1b   : > { %s220_s14 = scalar_lea.vmem %s879_s0, %s507_s11 }
  0x20 PF: > { %v241_v1 = vld [vmem:[%s220_s14] sm:$0xf]  ;;  %v247_v2 = vlaneseq  ;;  %v695_v3 = vmov 1983009808   ;;  %v696_v8 = vmov 0.0   ;;  %vm697_vm1 = vmmov 0  }
  0x21   : > { %v245_v4 = vunpack.c.l.s4 %v695_v3  ;;  %v243_v6 = vcombine.low %v241_v1, %v241_v1  ;;  %510 = vmatprep.subr.bf16.mxu0 %v696_v8  ;;  %512 = vmatprep.mubr.msk.bf16.mxu0 %vm697_vm1, %v696_v8  ;;  %s698_s24 = smov 127   ;;  %s699_s27 = smov 126   ;;  %vm263_vm2 = vcmask 1039360   ;;  %vm272_vm3 = vcmask 1041408   ;;  %v279_v23 = vld [vmem:[%s880_s1] sm:$0xf] }
  0x22   : > { %v248_v5 = vshrl.u32 %v247_v2, 7  ;;  %vm270_vm4 = vcmask 1031168   ;;  %vm276_vm5 = vcmask 1043456   ;;  %vm284_vm6 = vcmask 1045504   ;;  %p501_p2 = scmp.ne.s32.totalorder %s680_s19, 0 }
  0x23   : > { %v246_v7 = vunpack.c.0.s8 %v245_v4  ;;  %vm280_vm7 = vcmask 97280   ;;  %v350_v28 = vand.u32 (!%p501_p2), 127, %v247_v2  ;;  %v355_v31 = vld [vmem:[#allocation2] sm:$0xff] (!%p501_p2)  ;;  %vm359_vm9 = vcmask (!%p501_p2), 7168   ;;  %v361_v34 = vld [vmem:[#allocation3] sm:$0xff] (!%p501_p2) }
  0x25   : > { %v249_v9 = vsub.s32 %v246_v7, %v248_v5  ;;  %vm353_vm8 = vcmp.lt.s32.totalorder (!%p501_p2), %v350_v28, 16 }
  0x27   : > { %v250_v10 = vrot.slane %v243_v6, %v249_v9  ;;  %v257_v11 = vrot.slane %v241_v1, %v249_v9 }
  0x29   : > { %259 = vrot.lane.b32.xlu0 %v250_v10, %s698_s24  ;;  %v258_v12 = vcombine.high %v250_v10, %v250_v10  ;;  %v265_v13 = vcombine.low %v257_v11, %v257_v11 }
  0x2b   : > { %266 = vrot.lane.b32.xlu1 %v265_v13, %s699_s27 }
  0x2d   : > { %261 = vrot.lane.b32.xlu0 %v258_v12, %s698_s24 }
  0x2f   : > { %268 = vrot.lane.b32.xlu1 %v257_v11, %s699_s27 }
  0x9b   : > { %v260_v14 = vpop.permute.xlu0 %259 }
  0x9d   : > { %v267_v15 = vpop.permute.xlu1 %266 }
  0x9f   : > { %v262_v16 = vpop.permute.xlu0 %261 }
  0xa0   : > { %v264_v17 = vsel %vm263_vm2, %v260_v14, %v262_v16 }
  0xa1   : > { %v269_v18 = vpop.permute.xlu1 %268  ;;  %v275_v19 = vsel %vm272_vm3, %v241_v1, %v264_v17 }
  0xa2   : > { %v271_v20 = vsel %vm270_vm4, %v267_v15, %v269_v18 }
  0xa3   : > { %v278_v21 = vsel %vm276_vm5, %v275_v19, %v271_v20 }
  0xa4   : > { %v285_v22 = vsel %vm284_vm6, %v278_v21, 0 }
  0xa5   : > { %511 = vmatpush3.bf16.msra.mxu0 %v285_v22 }
  0xa8   : > { %513 = vmatmul.mubr.msk.bf16.vlgmr.msra.gmra.mrb[0].mxu0 %vm280_vm7, %v279_v23 }
 0x178   : > { %329 = sbr.rel (%p501_p2) target bundleno = 530 (0x212), region = 44 }
 0x17b   : > { %v321_v24 = vpop.f32.mrb[0].mxu0 }
 0x17c   : > { %v514_v25 = vpop.f32.mrb[1].mxu0  ;;  %v354_v29 = vsel (!%p501_p2), %vm353_vm8, %v321_v24, 0.0 }
 0x17d   : > { %v324_v26 = vpop.f32.mrb[2].mxu0  ;;  %356 = vadd.xlane.f32.xlu0 (!%p501_p2), %v354_v29  ;;  %v362_v30 = vmul.f32 (!%p501_p2), %v354_v29, %v354_v29 }
 0x17e   : > { %v515_v27 = vpop.f32.mrb[3].mxu0 }
 0x181   : > { %363 = vadd.xlane.f32.xlu0 %v362_v30 }
 0x20a   : > { %v357_v32 = vpop.xlane.xlu0 %356 }
 0x20b   : > { %v358_v33 = vadd.f32 %v357_v32, %v355_v31 }
 0x20d   : > { %360 = vst.msk [vmem:[#allocation2] sm:$0xff] %vm359_vm9, %v358_v33 }
 0x20e   : > { %v364_v35 = vpop.xlane.xlu0 %363 }
 0x20f   : > { %v365_v36 = vadd.f32 %v364_v35, %v361_v34 }
 0x211   : > { %366 = vst.msk [vmem:[#allocation3] sm:$0xff] %vm359_vm9, %v365_v36 }
 0x212 PF: > { %p502_p3 = scmp.ne.s32.totalorder %s680_s19, 1 }
 0x213   : > { %v700_v39 = vmov (!%p502_p3), 0   ;;  %v379_v45 = vld [vmem:[%s881_s2] sm:$0xff] (!%p502_p3) }
 0x214   : > { %370 = sbr.rel (%p502_p3) target bundleno = 693 (0x2b5), region = 56  ;;  %v371_v37 = vld [vmem:[#allocation2] sm:$0xff] (!%p502_p3)  ;;  %595 = vset.pattern.permute.xlu0 (!%p502_p3), %v700_v39 }
 0x215   : > { %v372_v40 = vmul.f32 (!%p502_p3), 0.03125, %v371_v37  ;;  %v381_v48 = vld [vmem:[%s882_s3] sm:$0xff] (!%p502_p3) }
 0x217   : > { %v375_v42 = vmul.f32 (!%p502_p3), %v372_v40, %v372_v40 }
 0x218   : > { %v373_v38 = vld [vmem:[#allocation3] sm:$0xff] (!%p502_p3) }
 0x219   : > { %v374_v41 = vmul.f32 (!%p502_p3), 0.03125, %v373_v38 }
 0x21b   : > { %v376_v43 = vsub.f32 %v374_v41, %v375_v42 }
 0x21d   : > { %v377_v44 = vadd.f32 1e-05, %v376_v43 }
 0x21f   : > { %596 = vrsqrt.f32 %v377_v44 }
 0x229   : > { %v597_v46 = vpop.eup %596 }
 0x22a   : > { %v380_v47 = vmul.f32 %v597_v46, %v379_v45 }
 0x22c   : > { %386 = vperm.xlu0 %595, %v380_v47   ;;  %v382_v49 = vmul.f32 %v380_v47, %v372_v40 }
 0x22e   : > { %v383_v50 = vsub.f32 %v381_v48, %v382_v49 }
 0x230   : > { %392 = vperm.xlu0 %595, %v383_v50  }
 0x2ab   : > { %v387_v51 = vpop.permute.xlu0 %386 }
 0x2ac   : > { %v389_v52 = vmul.f32 %v387_v51, %v321_v24 }
 0x2af   : > { %v393_v53 = vpop.permute.xlu0 %392 }
 0x2b0   : > { %v395_v54 = vadd.f32 %v393_v53, %v389_v52 }
 0x2b2   : > { %v396_v55 = vmax.f32 %v395_v54, 0.0 }
 0x2b4   : > { %397 = vst [vmem:[%s215_s23] sm:$0xff] %v396_v55 }
 0x2b5 PF: > { %s406_s13 = smul.u32 %s676_s18, %s680_s19  ;;  %s415_s14 = sshll.u32 %s215_s23, 4  ;;  %s828_s14 = int_to_ptr.vmem [resolvable:$true] %s415_s14 }
 0x2b6   : > { %s399_s6 = scalar_lea.sflag [#allocation5], %s213_s8  ;;  %s598_s10 = scalar_lea.vmem %s828_s14, 128 }
 0x2b7   : > { %s504_s24 = sshll.u32 %s406_s13, 7  ;;  %p599_p4 = scmp.ne.s32.totalorder %s828_s14, %s598_s10 }
 0x2b8   : > { %s413_s5 = scalar_lea.hbm %s883_s4, %s504_s24  ;;  %s701_s18 = smov [#allocation4]  }
 0x2b9   : > { %p600_p5 = pnand %p599_p4, %p780_p6  ;;  %s602_s19 = sshll.u32 %s701_s18, 4  ;;  %s603_s19 = int_to_ptr.vmem [resolvable:$false] %s602_s19 }
 0x2ba   : > { %s604_s9 = scalar_lea.vmem %s603_s19, 256  ;;  %p605_p9 = scmp.lt.s32.totalorder %s828_s14, %s603_s19 }
 0x2bb   : > { %p601_p7 = pneg %p600_p5  ;;  %p606_p10 = scmp.lt.s32.totalorder %s604_s9, %s598_s10 }
 0x2bd   : > { %p607_p11 = por %p606_p10, %p605_p9 }
 0x2bf   : > { %p608_p12 = pnand %p607_p11, %p601_p7 }
 0x2c1   : > { %611 = shalt.err (!%p608_p12)
}
 0x2c2   : > { %s612_s23 = scalar_lea.hbm %s413_s5, 128  ;;  %s616_s12 = scalar_lea.hbm %s883_s4, 256 }
 0x2c3   : > { %p613_p13 = scmp.ne.s32.totalorder %s413_s5, %s612_s23  ;;  %p617_p2 = scmp.lt.u32.totalorder %s413_s5, %s883_s4 }
 0x2c4   : > { %p618_p3 = scmp.lt.u32.totalorder %s616_s12, %s612_s23  ;;  %p620_p5 = scmp.lt.u32.totalorder %s612_s23, %s413_s5 }
 0x2c5   : > { %p614_p0 = pnand %p613_p13, %p780_p6 }
 0x2c6   : > { %p619_p4 = por %p618_p3, %p617_p2 }
 0x2c7   : > { %p615_p1 = pneg %p614_p0 }
 0x2c8   : > { %p621_p9 = por %p620_p5, %p619_p4 }
 0x2ca   : > { %p622_p7 = pnand %p621_p9, %p615_p1 }
 0x2cc   : > { %625 = shalt.err (!%p622_p7)
}
 0x2cd   : > { %516 = dma.vmem_to_hbm [thread:$0]  (%p780_p6), %s828_s14, 128, %s413_s5, %s399_s6  }
 0x2ce PF: > { %p522_p10 = scmp.ge.s32.totalorder %s692_s22, 2  ;;  %s427_s27 = sand.u32 1, %s664_s15  }
 0x2cf   : > { %s428_s30 = scalar_lea.sflag [#allocation5], %s427_s27 }
 0x2d0   : > { %p519_p11 = pnand %p522_p10, %p787_p8 }
 0x2d2   : > { %659 = dma.done.wait (!%p519_p11), %s428_s30, 128  }
 0x2d3   : > { %661 = vsyncadd (!%p519_p11), %s428_s30, 4294967168  ;;  %s17_s22 = sadd.s32 1, %s692_s22   ;;  %s886_s15 = smov %s668_s16 }
 0x2d4   : > { %p14_p12 = scmp.ge.s32.totalorder %s17_s22, 6   ;;  %s887_s16 = smov %s672_s17 }
 0x2d5   : > { %s888_s17 = smov %s796_s7  ;;  %s889_s18 = smov %s684_s20 }
 0x2d6   : > { %s890_s19 = smov %s688_s21  ;;  %s891_s20 = smov %s894_s25 }
 0x2d7   : > { %s892_s21 = smov %s898_s26  ;;  %16 = sbr.rel (!%p14_p12) target bundleno = 5 (0x5), region = 92 }
 0x2de   :  { %433 = vsyncpa [#allocation5], 1 }
 0x2df   :  { %435 = vsyncpa [#allocation5 + $0x1], 1 }

// kernel: conv_block_forward.2
= control target key start
LH: loop header
LB: loop body
LE: loop exit
PB: predicated region body
PF: predicated region fallthrough
CT: control target
= control target key end

     0   :  { %s645_s15 = smov 0   ;;  %s647_s16 = smov 0   ;;  %s717_s0 = inlined_call_operand.vmem [shape: bf16[2,4,256], index: 0, kind: input, shape index: {}]   ;;  %s718_s1 = inlined_call_operand.vmem [shape: bf16[4,12], index: 1, kind: input, shape index: {}]   ;;  %s719_s2 = inlined_call_operand.vmem [shape: f32[4,1], index: 2, kind: input, shape index: {}]   ;;  %s720_s3 = inlined_call_operand.vmem [shape: f32[4,1], index: 3, kind: input, shape index: {}]   ;;  %s721_s4 = inlined_call_operand.vmem [shape: bf16[2,4,128], index: 4, kind: output, shape index: {}]  }
   0x1   :  { %s649_s17 = smov 0   ;;  %s651_s18 = smov 0  }
   0x2   :  { %s653_s19 = smov 0  }
   0x3 LB: > { %s29_s20 = sadd.s32 1, %s603_s17  ;;  %s33_s21 = sadd.s32 1, %s607_s18  ;;  %s611_s19 = sphi %s653_s19, %s14_s19   ;;  %s607_s18 = sphi %s651_s18, %s725_s18   ;;  %s603_s17 = sphi %s649_s17, %s724_s17   ;;  %s599_s16 = sphi %s647_s16, %s723_s16   ;;  %s595_s15 = sphi %s645_s15, %s722_s15  }
   0x4   : > { %p31_p0 = scmp.ge.s32.totalorder %s29_s20, 2  ;;  %p503_p1 = scmp.ge.s32.totalorder %s611_s19, 1 }
   0x5   : > { %p187_p2 = scmp.lt.s32.totalorder %s611_s19, 5 }
   0x6   : > { %s727_s20 = smov (%p31_p0, %s29_s20), 0  ;;  %s729_s21 = smov (!%p31_p0, %s33_s21), %s607_s18 }
   0x7   : > { %p188_p3 = pnand %p503_p1, %p187_p2  ;;  %p35_p4 = scmp.ge.s32.totalorder %s729_s21, 2 }
   0x8   : > { %p217_p5 = scmp.lt.s32.totalorder (!%p188_p3), %s595_s15, 1  ;;  %s222_s22 = smul.u32 (!%p188_p3), %s595_s15, %s599_s16 }
   0x9   : > { %s731_s21 = smov (%p35_p4, %s729_s21), 0  ;;  %191 = sbr.rel (%p188_p3) target bundleno = 690 (0x2b2), region = 36 }
   0xa   : > { %p234_p6 = scmp.eq.s32.totalorder (!%p188_p3), %s599_s16, 0  ;;  %p235_p7 = scmp.eq.s32.totalorder (!%p188_p3), %s595_s15, 0 }
   0xb   : > { %p224_p8 = scmp.lt.s32.totalorder (!%p188_p3), %s222_s22, 1 }
   0xc   : > { %p236_p9 = pnand (!%p188_p3), %p235_p7, %p234_p6 }
  0x10   : > { %s733_s15 = smov (!%p217_p5, %s595_s15), 1  ;;  %s735_s22 = smov (!%p224_p8, %s222_s22), 1 }
  0x11   : > { %s513_s23 = sshll.u32 %s733_s15, 2  ;;  %s506_s27 = sshll.u32 %s735_s22, 1  ;;  %vm243_vm0 = vcmask (!%p236_p9), 3072   ;;  %v613_v0 = vmov (!%p236_p9), 0.0  }
  0x12   : > { %s221_s26 = scalar_lea.vmem %s717_s0, %s513_s23  ;;  %s685_s30 = scalar_lea.vmem %s721_s4, %s506_s27  ;;  %244 = vst.msk [vmem:[#allocation2] sm:$0xf] (!%p236_p9), %vm243_vm0, %v613_v0  ;;  %245 = vst.msk [vmem:[#allocation3] sm:$0xf] (!%p236_p9), %vm243_vm0, %v613_v0 }
  0x13   : > { %242 = sbr.rel (%p236_p9) target bundleno = 26 (0x1a), region = 40 }
  0x1a PF: > { %v251_v1 = vld [vmem:[%s221_s26] sm:$0xf]  ;;  %v257_v2 = vlaneseq  ;;  %v614_v3 = vmov 1983009808   ;;  %v615_v8 = vmov 0.0   ;;  %vm616_vm1 = vmmov 0  }
  0x1b   : > { %v255_v4 = vunpack.c.l.s4 %v614_v3  ;;  %v253_v6 = vcombine.low %v251_v1, %v251_v1  ;;  %516 = vmatprep.subr.bf16.mxu0 %v615_v8  ;;  %518 = vmatprep.mubr.msk.bf16.mxu0 %vm616_vm1, %v615_v8  ;;  %s617_s5 = smov 127   ;;  %s618_s6 = smov 126   ;;  %vm273_vm2 = vcmask 1039360   ;;  %vm282_vm3 = vcmask 1041408   ;;  %v289_v23 = vld [vmem:[%s718_s1] sm:$0x3] }
  0x1c   : > { %v258_v5 = vshrl.u32 %v257_v2, 7  ;;  %vm280_vm4 = vcmask 1031168   ;;  %vm286_vm5 = vcmask 1043456   ;;  %vm294_vm6 = vcmask 1045504   ;;  %p509_p10 = scmp.ne.s32.totalorder %s599_s16, 0 }
  0x1d   : > { %v256_v7 = vunpack.c.0.s8 %v255_v4  ;;  %vm290_vm7 = vcmask 97280   ;;  %v362_v28 = vand.u32 (!%p509_p10), 127, %v257_v2  ;;  %v367_v33 = vld [vmem:[#allocation2] sm:$0xf] (!%p509_p10)  ;;  %vm372_vm9 = vcmask (!%p509_p10), 3072  }
  0x1e   : > { %v374_v36 = vld [vmem:[#allocation3] sm:$0xf] (!%p509_p10) }
  0x1f   : > { %v259_v9 = vsub.s32 %v256_v7, %v258_v5  ;;  %vm365_vm8 = vcmp.lt.s32.totalorder (!%p509_p10), %v362_v28, 16 }
  0x21   : > { %v260_v10 = vrot.slane %v253_v6, %v259_v9  ;;  %v267_v11 = vrot.slane %v251_v1, %v259_v9 }
  0x23   : > { %269 = vrot.lane.b32.xlu0 %v260_v10, %s617_s5  ;;  %v268_v12 = vcombine.high %v260_v10, %v260_v10  ;;  %v275_v13 = vcombine.low %v267_v11, %v267_v11 }
  0x25   : > { %276 = vrot.lane.b32.xlu1 %v275_v13, %s618_s6 }
  0x27   : > { %271 = vrot.lane.b32.xlu0 %v268_v12, %s617_s5 }
  0x29   : > { %278 = vrot.lane.b32.xlu1 %v267_v11, %s618_s6 }
  0x95   : > { %v270_v14 = vpop.permute.xlu0 %269 }
  0x97   : > { %v277_v15 = vpop.permute.xlu1 %276 }
  0x99   : > { %v272_v16 = vpop.permute.xlu0 %271 }
  0x9a   : > { %v274_v17 = vsel %vm273_vm2, %v270_v14, %v272_v16 }
  0x9b   : > { %v279_v18 = vpop.permute.xlu1 %278  ;;  %v285_v19 = vsel %vm282_vm3, %v251_v1, %v274_v17 }
  0x9c   : > { %v281_v20 = vsel %vm280_vm4, %v277_v15, %v279_v18 }
  0x9d   : > { %v288_v21 = vsel %vm286_vm5, %v285_v19, %v281_v20 }
  0x9e   : > { %v295_v22 = vsel %vm294_vm6, %v288_v21, 0 }
  0x9f   : > { %517 = vmatpush3.bf16.msra.mxu0 %v295_v22 }
  0xa2   : > { %519 = vmatmul.mubr.msk.bf16.vlgmr.msra.gmra.mrb[0].mxu0 %vm290_vm7, %v289_v23 }
 0x172   : > { %339 = sbr.rel (%p509_p10) target bundleno = 525 (0x20d), region = 44 }
 0x175   : > { %v331_v24 = vpop.f32.mrb[0].mxu0 }
 0x176   : > { %v520_v25 = vpop.f32.mrb[1].mxu0  ;;  %v366_v29 = vsel (!%p509_p10), %vm365_vm8, %v331_v24, 0.0 }
 0x177   : > { %v334_v26 = vpop.f32.mrb[2].mxu0  ;;  %v368_v30 = vsel (!%p509_p10), %vm286_vm5, %v366_v29, 0.0  ;;  %v375_v31 = vmul.f32 (!%p509_p10), %v366_v29, %v366_v29 }
 0x178   : > { %v521_v27 = vpop.f32.mrb[3].mxu0  ;;  %369 = vadd.xlane.f32.xlu0 (!%p509_p10), %v368_v30 }
 0x179   : > { %v376_v32 = vsel %vm286_vm5, %v375_v31, 0.0 }
 0x17c   : > { %377 = vadd.xlane.f32.xlu0 %v376_v32 }
 0x205   : > { %v370_v34 = vpop.xlane.xlu0 %369 }
 0x206   : > { %v371_v35 = vadd.f32 %v370_v34, %v367_v33 }
 0x208   : > { %373 = vst.msk [vmem:[#allocation2] sm:$0xf] %vm372_vm9, %v371_v35 }
 0x209   : > { %v378_v37 = vpop.xlane.xlu0 %377 }
 0x20a   : > { %v379_v38 = vadd.f32 %v378_v37, %v374_v36 }
 0x20c   : > { %380 = vst.msk [vmem:[#allocation3] sm:$0xf] %vm372_vm9, %v379_v38 }
 0x20d PF: > { %p510_p11 = scmp.ne.s32.totalorder %s599_s16, 1 }
 0x20e   : > { %v619_v41 = vmov (!%p510_p11), 0   ;;  %v393_v47 = vld [vmem:[%s719_s2] sm:$0xf] (!%p510_p11) }
 0x20f   : > { %384 = sbr.rel (%p510_p11) target bundleno = 690 (0x2b2), region = 56  ;;  %v385_v39 = vld [vmem:[#allocation2] sm:$0xf] (!%p510_p11)  ;;  %570 = vset.pattern.permute.xlu0 (!%p510_p11), %v619_v41 }
 0x210   : > { %v386_v42 = vmul.f32 (!%p510_p11), 0.03125, %v385_v39  ;;  %v395_v50 = vld [vmem:[%s720_s3] sm:$0xf] (!%p510_p11) }
 0x212   : > { %v389_v44 = vmul.f32 (!%p510_p11), %v386_v42, %v386_v42 }
 0x213   : > { %v387_v40 = vld [vmem:[#allocation3] sm:$0xf] (!%p510_p11) }
 0x214   : > { %v388_v43 = vmul.f32 (!%p510_p11), 0.03125, %v387_v40 }
 0x216   : > { %v390_v45 = vsub.f32 %v388_v43, %v389_v44 }
 0x218   : > { %v391_v46 = vadd.f32 1e-05, %v390_v45 }
 0x21a   : > { %571 = vrsqrt.f32 %v391_v46 }
 0x224   : > { %v572_v48 = vpop.eup %571 }
 0x225   : > { %v394_v49 = vmul.f32 %v572_v48, %v393_v47 }
 0x227   : > { %400 = vperm.xlu0 %570, %v394_v49   ;;  %v396_v51 = vmul.f32 %v394_v49, %v386_v42 }
 0x229   : > { %v397_v52 = vsub.f32 %v395_v50, %v396_v51 }
 0x22b   : > { %406 = vperm.xlu0 %570, %v397_v52  }
 0x2a6   : > { %v401_v53 = vpop.permute.xlu0 %400 }
 0x2a7   : > { %v403_v54 = vmul.f32 %v401_v53, %v331_v24 }
 0x2aa   : > { %v407_v55 = vpop.permute.xlu0 %406 }
 0x2ab   : > { %v409_v56 = vadd.f32 %v407_v55, %v403_v54 }
 0x2ad   : > { %v410_v57 = vmax.f32 %v409_v56, 0.0 }
 0x2af   : > { %v411_v58 = vpack.c.bf16 %v410_v57, %v410_v57 }
 0x2b1   : > { %412 = vst [vmem:[%s685_s30] sm:$0x3] %v411_v58 }
 0x2b2 PF: > { %s14_s19 = sadd.s32 1, %s611_s19   ;;  %s722_s15 = smov %s603_s17 }
 0x2b3   : > { %p11_p12 = scmp.ge.s32.totalorder %s14_s19, 6   ;;  %s723_s16 = smov %s607_s18 }
 0x2b4   : > { %s724_s17 = smov %s727_s20  ;;  %s725_s18 = smov %s731_s21 }
 0x2b5   :  { %13 = sbr.rel (!%p11_p12) target bundleno = 3 (0x3), region = 87 }

</bundles_post_ra>
